<compile_context>
chip_gen: v6e
topology: v6e:2x2x1
jax: 0.10.0
libtpu: 0.0.40
codegen_flags: <defaults>
</compile_context>

<pallas_src>
import numpy as np
import jax
import jax.numpy as jnp
from jax.experimental import pallas as pl
from jax.experimental.pallas import tpu as pltpu


def make_relative_position_index(h, w):
    """Static buffer from RelativePositionBias.__init__ (numpy, host/compile time)."""
    coords = np.stack(np.meshgrid(np.arange(h), np.arange(w), indexing="ij"))  # (2,h,w)
    coords_flatten = coords.reshape(2, -1)                                     # (2,L)
    rel = coords_flatten[:, :, None] - coords_flatten[:, None, :]              # (2,L,L)
    rel = rel.transpose(1, 2, 0).copy()                                        # (L,L,2)
    rel[:, :, 0] += h - 1
    rel[:, :, 1] += w - 1
    rel[:, :, 0] *= 2 * h - 1   # faithful to the module (uses 2*h-1, not 2*w-1)
    return rel.sum(-1).astype(np.int32)                                        # (L,L)


def init_relative_position_bias(table, h, w):
    """One-time (module-init) construction of the kernel operands.

    table: (T, num_heads) f32 parameter, T = (2h-1)*(2w-1)  [PyTorch layout].
    Returns:
      table_t: (num_heads, T) f32   -- transposed parameter layout
      onehot : (T, L*L)      f32   -- 0/1 gather matrix, onehot[t, q*L+k] = (rel_index[q,k]==t)
    """
    T = (2 * h - 1) * (2 * w - 1)
    L = h * w
    idx = make_relative_position_index(h, w).reshape(-1)                       # (L*L,)
    if idx.min() < 0 or idx.max() >= T:
        # PyTorch would index out of range here as well; fail loudly instead of
        # letting the one-hot gather silently produce zero bias rows.
        raise ValueError(
            "relative_position_index out of range of the bias table "
            f"(min={int(idx.min())}, max={int(idx.max())}, table rows={T}); the "
            "module's (2*h-1) multiplier overflows for this rectangular window.")
    onehot = np.zeros((T, L * L), np.float32)
    onehot[idx, np.arange(L * L)] = 1.0
    table_t = jnp.asarray(table, jnp.float32).T   # one-time transpose at init, not per call
    return table_t, jnp.asarray(onehot)


def _bias_gather_kernel(table_t_ref, onehot_ref, out_ref):
    # Gather-as-matmul on the MXU: (num_heads, T) @ (T, L*L) -> (num_heads, L*L).
    # f32 operands; the 0/1 one-hot selects exactly one table entry per output lane.
    out_ref[...] = jnp.dot(table_t_ref[...], onehot_ref[...],
                           preferred_element_type=jnp.float32)


def relative_position_bias(table_t, onehot, num_heads, h, w, H, W):
    """forward(H, W) of RelativePositionBias(num_heads, h, w).

    table_t / onehot come from init_relative_position_bias() (built once at init).
    """
    T = (2 * h - 1) * (2 * w - 1)
    L = h * w
    rh, rw = H // h, W // w

    flops = 2 * num_heads * T * L * L
    bytes_accessed = (num_heads * T + T * L * L + num_heads * L * L) * 4

    # No grid: single invocation, whole-array VMEM operands (launch-overhead-bound
    # workload; no pipeline scaffolding or double buffering needed).
    bias2 = pl.pallas_call(
        _bias_gather_kernel,
        out_shape=jax.ShapeDtypeStruct((num_heads, L * L), jnp.float32),
        in_specs=[pl.BlockSpec(memory_space=pltpu.MemorySpace.VMEM),
                  pl.BlockSpec(memory_space=pltpu.MemorySpace.VMEM)],
        out_specs=pl.BlockSpec(memory_space=pltpu.MemorySpace.VMEM),
        cost_estimate=pl.CostEstimate(flops=flops, transcendentals=0,
                                      bytes_accessed=bytes_accessed),
    )(table_t, onehot)

    # Spatial expansion (repeat_interleave over H//h and W//w) + final permute:
    # a single broadcast of the compact, lane-dense kernel output.
    #   bias2[head, (i*w + j)*L + k] -> out[0, head, (i*rh + r)*W + (j*rw + s), k]
    bias = bias2.reshape(num_heads, h, 1, w, 1, L)
    bias = jnp.broadcast_to(bias, (num_heads, h, rh, w, rw, L))
    return bias.reshape(1, num_heads, H * W, L)


if __name__ == "__main__":
    # Small, module-consistent shapes.
    num_heads, h, w = 4, 4, 4
    H, W = 8, 8                       # forward(H, W) with H % h == 0, W % w == 0
    T = (2 * h - 1) * (2 * w - 1)
    L = h * w

    key = jax.random.PRNGKey(0)
    # The module's nn.Parameter, in its PyTorch layout (T, num_heads).
    table = jax.random.normal(key, (T, num_heads), dtype=jnp.float32) * 0.02

    # One-time init: transposed table + precomputed one-hot gather matrix.
    table_t, onehot = init_relative_position_bias(table, h, w)

    fwd = jax.jit(relative_position_bias, static_argnums=(2, 3, 4, 5, 6))
    out = jax.block_until_ready(fwd(table_t, onehot, num_heads, h, w, H, W))

    # Pure-JAX reference of the PyTorch forward (f32 end to end).
    rel_index = jnp.asarray(make_relative_position_index(h, w))

    def ref_forward(tbl):
        b = tbl[rel_index.reshape(-1)].reshape(h, w, L, num_heads)
        b = jnp.repeat(b, H // h, axis=0)
        b = jnp.repeat(b, W // w, axis=1)
        return b.reshape(H * W, L, num_heads).transpose(2, 0, 1)[None]

    ref = ref_forward(table)
    assert out.shape == (1, num_heads, H * W, L), out.shape
    assert out.dtype == jnp.float32
    assert jnp.allclose(out, ref, atol=1e-5, rtol=1e-6), \
        float(jnp.abs(out - ref).max())
    print("KERNEL_OK")
</pallas_src>

<mosaic_0001>
module attributes {stable_mosaic.version = 11 : i64} {
  func.func @_bias_gather_kernel(%arg0: memref<4x49xf32, #tpu.memory_space<vmem>>, %arg1: memref<49x256xf32, #tpu.memory_space<vmem>>, %arg2: memref<4x256xf32, #tpu.memory_space<vmem>>) attributes {dimension_semantics = [], scalar_prefetch = 0 : i64, scratch_operands = 0 : i64, tpu.core_type = #tpu.core_type<tc>} {
    %c0 = arith.constant 0 : index
    %c0_0 = arith.constant 0 : index
    %0 = vector.load %arg0[%c0, %c0_0] : memref<4x49xf32, #tpu.memory_space<vmem>>, vector<4x49xf32>
    %c0_1 = arith.constant 0 : index
    %c0_2 = arith.constant 0 : index
    %1 = vector.load %arg1[%c0_1, %c0_2] : memref<49x256xf32, #tpu.memory_space<vmem>>, vector<49x256xf32>
    %cst = arith.constant dense<0.000000e+00> : vector<4x256xf32>
    %2 = tpu.matmul %0, %1, %cst {dimension_numbers = #tpu.dot_dimension_numbers<[1], [0], [0], [1], [0, 0, 1, 1], [], []>} : vector<4x49xf32>, vector<49x256xf32>, vector<4x256xf32> -> vector<4x256xf32>
    %c0_3 = arith.constant 0 : index
    %c0_4 = arith.constant 0 : index
    %3 = vector.load %arg2[%c0_3, %c0_4] : memref<4x256xf32, #tpu.memory_space<vmem>>, vector<4x256xf32>
    tpu.vector_store %arg2[%c0_3, %c0_4], %2 {strides = array<i32>} : memref<4x256xf32, #tpu.memory_space<vmem>>, vector<4x256xf32>,
    return
  }
}

</mosaic_0001>

<bundles_post_ra>
// kernel: relative_position_bias.1
= control target key start
LH: loop header
LB: loop body
LE: loop exit
PB: predicated region body
PF: predicated region fallthrough
CT: control target
= control target key end

     0   :  { %7 = vsyncpa [#allocation3], 0  ;;  %s226_s0 = inlined_call_operand.hbm [shape: f32[4,49], index: 0, kind: input, shape index: {}]   ;;  %s227_s1 = inlined_call_operand.hbm [shape: f32[49,256], index: 1, kind: input, shape index: {}]   ;;  %s228_s2 = inlined_call_operand.vmem [shape: f32[4,256], index: 2, kind: output, shape index: {}]  }
   0x1   :  { %8 = vsyncpa [#allocation5], 0  ;;  %s197_s9 = smov [#allocation2]   ;;  %s198_s11 = smov [#allocation4]  }
   0x2   :  { %s15_s10 = sshll.u32 %s197_s9, 4  ;;  %s24_s12 = sshll.u32 %s198_s11, 4  ;;  %s16_s10 = int_to_ptr.vmem [resolvable:$true] %s15_s10  ;;  %s25_s12 = int_to_ptr.vmem [resolvable:$true] %s24_s12 }
   0x3   :  { %s161_s13 = scalar_lea.vmem %s16_s10, 64  ;;  %p166_p1 = scmp.lt.s32.totalorder %s16_s10, %s16_s10 }
   0x4   :  { %p162_p0 = scmp.ne.s32.totalorder %s16_s10, %s161_s13  ;;  %p167_p2 = scmp.lt.s32.totalorder %s161_s13, %s161_s13 }
   0x6   :  { %p168_p3 = por %p167_p2, %p166_p1 }
   0x8   :  { %p169_p4 = pnand %p168_p3, %p162_p0 }
   0xa   :  { %172 = shalt.err (!%p169_p4)
}
   0xb   :  { %18 = dma.hbm_to_vmem [thread:$0]  %s226_s0, 64, %s16_s10, [#allocation3]  }
   0xc   :  { %s181_s16 = scalar_lea.vmem %s25_s12, 1792  ;;  %p186_p6 = scmp.lt.s32.totalorder %s25_s12, %s25_s12 }
   0xd   :  { %p182_p5 = scmp.ne.s32.totalorder %s25_s12, %s181_s16  ;;  %p187_p7 = scmp.lt.s32.totalorder %s181_s16, %s181_s16 }
   0xf   :  { %p188_p8 = por %p187_p7, %p186_p6 }
  0x11   :  { %p189_p9 = pnand %p188_p8, %p182_p5 }
  0x13   :  { %192 = shalt.err (!%p189_p9)
}
  0x14   :  { %s199_s17 = smov 256   ;;  %s200_s18 = smov 16  }
  0x15   :  { %30 = dma.hbm_to_vmem [thread:$0]  %s227_s1, 1792, %s25_s12, [#allocation5], %s199_s17, %s199_s17, %s200_s18  }
  0x16   :  { %193 = dma.done.wait [#allocation3], 64  }
  0x17   :  { %194 = vsyncadd [#allocation3], 4294967232 }
  0x18   :  { %195 = dma.done.wait [#allocation5], 1792  }
  0x19   :  { %196 = vsyncadd [#allocation5], 4294965504  ;;  %v201_v0 = vmov 0.0   ;;  %vm56_vm0 = vcmask 1040384   ;;  %v51_v1 = vld [vmem:[#allocation4 + $0x68] sm:$0x1] }
  0x1a   :  { %127 = vmatprep.mubr.f32.mxu0 %v201_v0  ;;  %v50_v2 = vld [vmem:[#allocation4 + $0x60] sm:$0x1]  ;;  %v49_v3 = vld [vmem:[#allocation4 + $0x58] sm:$0xff]  ;;  %145 = vmatprep.subr.msk.mxu0 %vm56_vm0, %v51_v1  ;;  %v48_v4 = vld [vmem:[#allocation4 + $0x50] sm:$0xff]  ;;  %vm52_vm1 = vcmask 400384  }
  0x1b   :  { %146 = vmatpush1.msk.msra.mxu0 %vm56_vm0, %v50_v2  ;;  %v47_v5 = vld [vmem:[#allocation4 + $0x48] sm:$0xff]  ;;  %v46_v6 = vld [vmem:[#allocation4 + $0x40] sm:$0xff]  ;;  %v45_v7 = vld [vmem:[#allocation4 + $0x38] sm:$0xff] }
  0x1c   :  { %83 = vmatprep.subr.mxu0 %v49_v3  ;;  %v44_v8 = vld [vmem:[#allocation4 + $0x30] sm:$0xff]  ;;  %v43_v9 = vld [vmem:[#allocation4 + $0x28] sm:$0xff]  ;;  %v42_v10 = vld [vmem:[#allocation4 + $0x20] sm:$0xff] }
  0x1d   :  { %84 = vmatpush1.msra.mxu0 %v48_v4  ;;  %v41_v11 = vld [vmem:[#allocation4 + $0x18] sm:$0xff]  ;;  %v40_v12 = vld [vmem:[#allocation4 + $0x10] sm:$0xff]  ;;  %v39_v13 = vld [vmem:[#allocation4 + $0x8] sm:$0xff] }
  0x1e   :  { %85 = vmatprep.subr.mxu0 %v47_v5  ;;  %v38_v14 = vld [vmem:[#allocation4] sm:$0xff]  ;;  %v37_v15 = vld [vmem:[#allocation2] sm:$0xf] }
  0x1f   :  { %86 = vmatpush1.msra.mxu0 %v46_v6 }
  0x20   :  { %87 = vmatprep.subr.mxu0 %v45_v7 }
  0x21   :  { %88 = vmatpush1.msra.mxu0 %v44_v8 }
  0x22   :  { %89 = vmatprep.subr.mxu0 %v43_v9 }
  0x23   :  { %90 = vmatpush1.msra.mxu0 %v42_v10 }
  0x24   :  { %91 = vmatprep.subr.mxu0 %v41_v11 }
  0x25   :  { %92 = vmatpush1.msra.mxu0 %v40_v12 }
  0x26   :  { %93 = vmatprep.subr.mxu0 %v39_v13 }
  0x27   :  { %94 = vmatpush1.msra.mxu0 %v38_v14 }
  0x28   :  { %147 = vmatmul.mubr.msk.f32.vlgmr.msra.gmra.mxu0 %vm52_vm1, %v37_v15 }
  0xe8   :  { %v129_v16 = vpop.f32.mrf.mxu0 }
  0xea   :  { %v131_v17 = vpop.f32.mrf.mxu0 }
  0xeb   :  { %v136_v18 = vcombine.low %v129_v16, %v131_v17 }
  0xed   :  { %138 = vst [vmem:[%s228_s2] sm:$0xff] %v136_v18 }
  0xee   :  { %143 = vsyncpa [#allocation3], 1 }
  0xef   :  { %144 = vsyncpa [#allocation5], 1 }

</bundles_post_ra>
